<compile_context>
chip_gen: v6e
topology: v6e:2x2x1
jax: 0.10.0
libtpu: 0.0.40
codegen_flags: <defaults>
</compile_context>

<pallas_src>
import functools

import jax
import jax.numpy as jnp
from jax.experimental import pallas as pl
from jax.experimental.pallas import tpu as pltpu


def _mlp_kernel(x_ref, w1_ref, b1_ref, w2_ref, b2_ref, o_ref):
    # Cast the streamed activations to bf16 in-kernel (VPU work hidden under DMA).
    x = x_ref[...].astype(jnp.bfloat16)
    # Layer 1: bf16 MXU matmul, f32 accumulate; bias + ReLU in f32 on the VPU.
    h = jnp.dot(x, w1_ref[...], preferred_element_type=jnp.float32)
    h = jnp.maximum(h + b1_ref[...], 0.0)
    # Layer 2: bf16 MXU matmul against the lane-padded w2 (VMEM-only padding),
    # f32 accumulate; only the first C columns leave the kernel.
    out = jnp.dot(h.astype(jnp.bfloat16), w2_ref[...],
                  preferred_element_type=jnp.float32)
    c = o_ref.shape[1]
    o_ref[...] = (out[:, :c] + b2_ref[...]).astype(o_ref.dtype)


def _round_up(x, m):
    return (x + m - 1) // m * m


@functools.partial(jax.jit, static_argnames=("block_b",))
def emotion_classifier_forward(x, w1, b1, w2, b2, *, block_b=2048):
    """Pallas forward pass matching nn.Sequential(Linear, ReLU, Linear).

    x:  (B, D) activations (f32 or bf16).
    w1: (D, H), b1: (1, H)   -- first Linear, stored as (in, out).
    w2: (H, C), b2: (1, C)   -- second Linear.
    Returns (B, C) float32 logits.
    """
    B, D = x.shape
    H = w1.shape[1]
    C = w2.shape[1]

    DP = _round_up(D, 128)      # lane-align the contraction dim of layer 1
    CP = _round_up(C, 128)      # MXU lane width for layer 2 (VMEM only)
    BP = _round_up(B, 8)        # sublane-align the batch only

    # Stream x directly (no wrapper copy) when already aligned; otherwise pad
    # minimally with exact zeros.  No dtype conversion here — done in-kernel.
    if B == BP and D == DP:
        xs = x
    else:
        xs = jnp.zeros((BP, DP), x.dtype).at[:B, :D].set(x)

    # Weights are tiny (~16 KiB bf16): pad/cast in the wrapper, resident in VMEM.
    w1p = jnp.zeros((DP, H), jnp.bfloat16).at[:D, :].set(w1.astype(jnp.bfloat16))
    b1p = b1.astype(jnp.float32).reshape(1, H)
    w2p = jnp.zeros((H, CP), jnp.bfloat16).at[:, :C].set(w2.astype(jnp.bfloat16))
    b2p = b2.astype(jnp.float32).reshape(1, C)

    # Batch tile: large to amortize per-step overhead, but at least two grid
    # steps when the batch allows so both v7x TensorCores get work.
    TB = min(block_b, max(8, _round_up(pl.cdiv(BP, 2), 8)))
    grid = (pl.cdiv(BP, TB),)   # partial last block allowed (Pallas masks OOB)

    out = pl.pallas_call(
        _mlp_kernel,
        out_shape=jax.ShapeDtypeStruct((BP, C), jnp.float32),
        grid=grid,
        in_specs=[
            pl.BlockSpec((TB, DP), lambda i: (i, 0)),   # x: streamed per tile
            pl.BlockSpec((DP, H), lambda i: (0, 0)),    # w1: resident
            pl.BlockSpec((1, H), lambda i: (0, 0)),     # b1: resident
            pl.BlockSpec((H, CP), lambda i: (0, 0)),    # w2: resident (lane-padded)
            pl.BlockSpec((1, C), lambda i: (0, 0)),     # b2: resident
        ],
        out_specs=pl.BlockSpec((TB, C), lambda i: (i, 0)),  # only C cols to HBM
        compiler_params=pltpu.CompilerParams(
            dimension_semantics=("parallel",),   # megacore split on v7x
        ),
    )(xs, w1p, b1p, w2p, b2p)

    return out[:B] if BP != B else out


def init_params(key, input_dim=128, hidden=64, num_classes=3, dtype=jnp.float32):
    # Deterministic synthetic init (mimics PyTorch Linear's uniform(-1/sqrt(in), 1/sqrt(in))).
    k1, k2, k3, k4 = jax.random.split(key, 4)
    bound1 = 1.0 / jnp.sqrt(input_dim)
    bound2 = 1.0 / jnp.sqrt(hidden)
    w1 = jax.random.uniform(k1, (input_dim, hidden), dtype, -bound1, bound1)
    b1 = jax.random.uniform(k2, (1, hidden), dtype, -bound1, bound1)
    w2 = jax.random.uniform(k3, (hidden, num_classes), dtype, -bound2, bound2)
    b2 = jax.random.uniform(k4, (1, num_classes), dtype, -bound2, bound2)
    return w1, b1, w2, b2


def reference_forward_f32(x, w1, b1, w2, b2):
    h = jnp.maximum(x @ w1 + b1, 0.0)
    return h @ w2 + b2


def reference_forward_bf16(x, w1, b1, w2, b2):
    # Mirrors the kernel's dtype handling exactly (bf16 MXU inputs, f32 accum).
    h = jnp.dot(x.astype(jnp.bfloat16), w1.astype(jnp.bfloat16),
                preferred_element_type=jnp.float32)
    h = jnp.maximum(h + b1.astype(jnp.float32), 0.0)
    out = jnp.dot(h.astype(jnp.bfloat16), w2.astype(jnp.bfloat16),
                  preferred_element_type=jnp.float32)
    return out + b2.astype(jnp.float32)


if __name__ == "__main__":
    key = jax.random.PRNGKey(0)
    kx, kp = jax.random.split(key)

    batch, input_dim, hidden, num_classes = 8, 128, 64, 3
    x = jax.random.normal(kx, (batch, input_dim), jnp.float32)
    w1, b1, w2, b2 = init_params(kp, input_dim, hidden, num_classes)

    out = emotion_classifier_forward(x, w1, b1, w2, b2)
    out = jax.block_until_ready(out)
    assert out.shape == (batch, num_classes)

    # Tight check against a reference that performs the identical bf16/f32 math.
    ref_bf16 = reference_forward_bf16(x, w1, b1, w2, b2)
    assert jnp.allclose(out, ref_bf16, atol=1e-3, rtol=1e-3), "mismatch vs bf16 reference"

    # Loose check against the pure-f32 module semantics (bf16 cast tolerance).
    ref_f32 = reference_forward_f32(x, w1, b1, w2, b2)
    assert jnp.allclose(out, ref_f32, atol=5e-2, rtol=5e-2), "mismatch vs f32 reference"

    print("KERNEL_OK")
</pallas_src>

<mosaic_0001>
module attributes {stable_mosaic.version = 11 : i64} {
  func.func @_mlp_kernel(%arg0: i32, %arg1: memref<8x128xf32, #tpu.memory_space<vmem>>, %arg2: memref<128x64xbf16, #tpu.memory_space<vmem>>, %arg3: memref<1x64xf32, #tpu.memory_space<vmem>>, %arg4: memref<64x128xbf16, #tpu.memory_space<vmem>>, %arg5: memref<1x3xf32, #tpu.memory_space<vmem>>, %arg6: memref<8x3xf32, #tpu.memory_space<vmem>>) attributes {dimension_semantics = [#tpu.dimension_semantics<parallel>], iteration_bounds = array<i64: 1>, scalar_prefetch = 0 : i64, scratch_operands = 0 : i64, tpu.core_type = #tpu.core_type<tc>, window_params = [{transform_indices = @transform_0, window_bounds = array<i64: 8, 128>}, {pipeline_mode = #tpu.pipeline_mode<synchronous>, transform_indices = @transform_1, window_bounds = array<i64: 128, 64>}, {pipeline_mode = #tpu.pipeline_mode<synchronous>, transform_indices = @transform_2, window_bounds = array<i64: 1, 64>}, {pipeline_mode = #tpu.pipeline_mode<synchronous>, transform_indices = @transform_3, window_bounds = array<i64: 64, 128>}, {pipeline_mode = #tpu.pipeline_mode<synchronous>, transform_indices = @transform_4, window_bounds = array<i64: 1, 3>}, {transform_indices = @transform_5, window_bounds = array<i64: 8, 3>}]} {
    %c0 = arith.constant 0 : index
    %c0_0 = arith.constant 0 : index
    %0 = vector.load %arg1[%c0, %c0_0] : memref<8x128xf32, #tpu.memory_space<vmem>>, vector<8x128xf32>
    %1 = arith.truncf %0 : vector<8x128xf32> to vector<8x128xbf16>
    %c0_1 = arith.constant 0 : index
    %c0_2 = arith.constant 0 : index
    %2 = vector.load %arg2[%c0_1, %c0_2] : memref<128x64xbf16, #tpu.memory_space<vmem>>, vector<128x64xbf16>
    %cst = arith.constant dense<0.000000e+00> : vector<8x64xf32>
    %3 = tpu.matmul %1, %2, %cst {dimension_numbers = #tpu.dot_dimension_numbers<[1], [0], [0], [1], [0, 0, 1, 1], [], []>} : vector<8x128xbf16>, vector<128x64xbf16>, vector<8x64xf32> -> vector<8x64xf32>
    %c0_3 = arith.constant 0 : index
    %c0_4 = arith.constant 0 : index
    %4 = vector.load %arg3[%c0_3, %c0_4] : memref<1x64xf32, #tpu.memory_space<vmem>>, vector<1x64xf32>
    %5 = vector.broadcast %4 : vector<1x64xf32> to vector<8x64xf32>
    %6 = arith.addf %3, %5 : vector<8x64xf32>
    %cst_5 = arith.constant 0.000000e+00 : f32
    %7 = vector.broadcast %cst_5 : f32 to vector<8x64xf32>
    %8 = arith.maximumf %6, %7 : vector<8x64xf32>
    %9 = arith.truncf %8 : vector<8x64xf32> to vector<8x64xbf16>
    %c0_6 = arith.constant 0 : index
    %c0_7 = arith.constant 0 : index
    %10 = vector.load %arg4[%c0_6, %c0_7] : memref<64x128xbf16, #tpu.memory_space<vmem>>, vector<64x128xbf16>
    %cst_8 = arith.constant dense<0.000000e+00> : vector<8x128xf32>
    %11 = tpu.matmul %9, %10, %cst_8 {dimension_numbers = #tpu.dot_dimension_numbers<[1], [0], [0], [1], [0, 0, 1, 1], [], []>} : vector<8x64xbf16>, vector<64x128xbf16>, vector<8x128xf32> -> vector<8x128xf32>
    %12 = vector.extract_strided_slice %11 {offsets = [0, 0], sizes = [8, 3], strides = [1, 1]} : vector<8x128xf32> to vector<8x3xf32>
    %c0_9 = arith.constant 0 : index
    %c0_10 = arith.constant 0 : index
    %13 = vector.load %arg5[%c0_9, %c0_10] : memref<1x3xf32, #tpu.memory_space<vmem>>, vector<1x3xf32>
    %14 = vector.broadcast %13 : vector<1x3xf32> to vector<8x3xf32>
    %15 = arith.addf %12, %14 : vector<8x3xf32>
    %c0_11 = arith.constant 0 : index
    %c0_12 = arith.constant 0 : index
    %16 = vector.load %arg6[%c0_11, %c0_12] : memref<8x3xf32, #tpu.memory_space<vmem>>, vector<8x3xf32>
    tpu.vector_store %arg6[%c0_11, %c0_12], %15 {strides = array<i32>} : memref<8x3xf32, #tpu.memory_space<vmem>>, vector<8x3xf32>,
    return
  }
  func.func @transform_0(%arg0: i32) -> (i32, i32) {
    %c0_i32 = arith.constant 0 : i32
    %c0_i32_0 = arith.constant 0 : i32
    return %arg0, %c0_i32 : i32, i32
  }
  func.func @transform_1(%arg0: i32) -> (i32, i32) {
    %c0_i32 = arith.constant 0 : i32
    %c0_i32_0 = arith.constant 0 : i32
    %c0_i32_1 = arith.constant 0 : i32
    return %c0_i32, %c0_i32_0 : i32, i32
  }
  func.func @transform_2(%arg0: i32) -> (i32, i32) {
    %c0_i32 = arith.constant 0 : i32
    %c0_i32_0 = arith.constant 0 : i32
    %c0_i32_1 = arith.constant 0 : i32
    return %c0_i32, %c0_i32_0 : i32, i32
  }
  func.func @transform_3(%arg0: i32) -> (i32, i32) {
    %c0_i32 = arith.constant 0 : i32
    %c0_i32_0 = arith.constant 0 : i32
    %c0_i32_1 = arith.constant 0 : i32
    return %c0_i32, %c0_i32_0 : i32, i32
  }
  func.func @transform_4(%arg0: i32) -> (i32, i32) {
    %c0_i32 = arith.constant 0 : i32
    %c0_i32_0 = arith.constant 0 : i32
    %c0_i32_1 = arith.constant 0 : i32
    return %c0_i32, %c0_i32_0 : i32, i32
  }
  func.func @transform_5(%arg0: i32) -> (i32, i32) {
    %c0_i32 = arith.constant 0 : i32
    %c0_i32_0 = arith.constant 0 : i32
    return %arg0, %c0_i32 : i32, i32
  }
}

</mosaic_0001>

<bundles_post_ra>
// kernel: emotion_classifier_forward.1
= control target key start
LH: loop header
LB: loop body
LE: loop exit
PB: predicated region body
PF: predicated region fallthrough
CT: control target
= control target key end

     0   :  { %v301_v0 = vmov 0.0   ;;  %vm302_vm0 = vmmov 0   ;;  %vm168_vm1 = vcmask 523264   ;;  %vm220_vm2 = vcmask 23552   ;;  %s381_s1 = inlined_call_operand.vmem [shape: bf16[128,64], index: 1, kind: input, shape index: {}]   ;;  %s382_s3 = inlined_call_operand.vmem [shape: bf16[64,128], index: 3, kind: input, shape index: {}]   ;;  %s383_s0 = inlined_call_operand.vmem [shape: f32[8,128], index: 0, kind: input, shape index: {}]   ;;  %s384_s2 = inlined_call_operand.vmem [shape: f32[1,64], index: 2, kind: input, shape index: {}]   ;;  %s385_s4 = inlined_call_operand.vmem [shape: f32[1,3], index: 4, kind: input, shape index: {}]   ;;  %s386_s5 = inlined_call_operand.vmem [shape: f32[8,3], index: 5, kind: output, shape index: {}]  }
   0x1   :  { %255 = vmatprep.subr.bf16.mxu0 %v301_v0  ;;  %v289_v1 = vld [vmem:[%s381_s1 + $0x38] sm:$0xff]   ;;  %271 = vmatprep.mubr.msk.bf16.mxu0 %vm302_vm0, %v301_v0  ;;  %v290_v2 = vld [vmem:[%s381_s1 + $0x30] sm:$0xff]   ;;  %v291_v3 = vld [vmem:[%s381_s1 + $0x28] sm:$0xff]  }
   0x2   :  { %275 = vmatprep.subr.bf16.mxu1 %v301_v0  ;;  %283 = vmatprep.mubr.msk.bf16.mxu1 %vm302_vm0, %v301_v0  ;;  %v297_v4 = vld [vmem:[%s382_s3 + $0x18] sm:$0xff]   ;;  %v292_v5 = vld [vmem:[%s381_s1 + $0x20] sm:$0xff]   ;;  %v298_v6 = vld [vmem:[%s382_s3 + $0x10] sm:$0xff]  }
   0x3   :  { %256 = vmatpush3.bf16.msra.mxu0 %v289_v1  ;;  %276 = vmatpush3.bf16.msra.mxu1 %v297_v4  ;;  %v293_v7 = vld [vmem:[%s381_s1 + $0x18] sm:$0xff]   ;;  %v294_v8 = vld [vmem:[%s381_s1 + $0x10] sm:$0xff]   ;;  %v295_v9 = vld [vmem:[%s381_s1 + $0x8] sm:$0xff]  }
   0x4   :  { %257 = vmatprep.subr.bf16.mxu0 %v301_v0  ;;  %277 = vmatprep.subr.bf16.mxu1 %v301_v0  ;;  %v296_v10 = vld [vmem:[%s381_s1] sm:$0xff]   ;;  %v299_v13 = vld [vmem:[%s382_s3 + $0x8] sm:$0xff]  }
   0x5   :  { %v21_v11 = vld [vmem:[%s383_s0] sm:$0xff] }
   0x6   :  { %v22_v12 = vpack.c.bf16 %v21_v11, %v21_v11  ;;  %v300_v14 = vld [vmem:[%s382_s3] sm:$0xff]  }
   0x7   :  { %258 = vmatpush3.bf16.msra.mxu0 %v290_v2  ;;  %278 = vmatpush3.bf16.msra.mxu1 %v298_v6  ;;  %v226_v15 = vld [vmem:[%s384_s2] ss:$0 sm:$0xff] }
   0x8   :  { %259 = vmatprep.subr.bf16.mxu0 %v301_v0  ;;  %279 = vmatprep.subr.bf16.mxu1 %v301_v0  ;;  %v240_v23 = vld [vmem:[%s385_s4] ss:$0 sm:$0xff] }
   0xb   :  { %260 = vmatpush3.bf16.msra.mxu0 %v291_v3  ;;  %280 = vmatpush3.bf16.msra.mxu1 %v299_v13 }
   0xc   :  { %261 = vmatprep.subr.bf16.mxu0 %v301_v0  ;;  %281 = vmatprep.subr.bf16.mxu1 %v301_v0 }
   0xf   :  { %262 = vmatpush3.bf16.msra.mxu0 %v292_v5  ;;  %282 = vmatpush3.bf16.msra.mxu1 %v300_v14 }
  0x10   :  { %263 = vmatprep.subr.bf16.mxu0 %v301_v0 }
  0x13   :  { %264 = vmatpush3.bf16.msra.mxu0 %v293_v7 }
  0x14   :  { %265 = vmatprep.subr.bf16.mxu0 %v301_v0 }
  0x17   :  { %266 = vmatpush3.bf16.msra.mxu0 %v294_v8 }
  0x18   :  { %267 = vmatprep.subr.bf16.mxu0 %v301_v0 }
  0x1b   :  { %268 = vmatpush3.bf16.msra.mxu0 %v295_v9 }
  0x1c   :  { %269 = vmatprep.subr.bf16.mxu0 %v301_v0 }
  0x1f   :  { %270 = vmatpush3.bf16.msra.mxu0 %v296_v10 }
  0x22   :  { %272 = vmatmul.mubr.bf16.vlgmr.msra.gmra.mxu0 %v22_v12 }
  0xe2   :  { %v128_v16 = vpop.f32.mrf.mxu0 }
  0xe3   :  { %v129_v17 = vadd.f32 %v226_v15, %v128_v16 }
  0xe4   :  { %v273_v18 = vpop.f32.mrf.mxu0 }
  0xe5   :  { %v134_v19 = vmax.f32 %v129_v17, 0.0 }
  0xe6   :  { %v131_v20 = vpop.f32.mrf.mxu0 }
  0xe7   :  { %v135_v21 = vpack.c.bf16 %v134_v19, %v134_v19 }
  0xe8   :  { %v274_v22 = vpop.f32.mrf.mxu0 }
  0xe9   :  { %284 = vmatmul.mubr.msk.bf16.vlgmr.msra.gmra.mxu1 %vm168_vm1, %v135_v21 }
 0x1a9   :  { %v206_v24 = vpop.f32.mrf.mxu1 }
 0x1aa   :  { %v219_v25 = vadd.f32 %v240_v23, %v206_v24 }
 0x1ab   :  { %v285_v26 = vpop.f32.mrf.mxu1 }
 0x1ac   :  { %221 = vst.msk [vmem:[%s386_s5] sm:$0xff] %vm220_vm2, %v219_v25 }
 0x1ad   :  { %v209_v27 = vpop.f32.mrf.mxu1 }
 0x1af   :  { %v286_v28 = vpop.f32.mrf.mxu1 }

</bundles_post_ra>
